<compile_context>
chip_gen: v7x
topology: tpu7x:2x2x1
jax: 0.10.0
libtpu: 0.0.40
codegen_flags: <defaults>
</compile_context>

<pallas_src>
import functools

import jax
import jax.numpy as jnp
from jax import lax
from jax.experimental import pallas as pl
from jax.experimental.pallas import tpu as pltpu


def _simclr_rowblock_kernel(zrow_ref, zcol_ref, zpart_ref, out_ref, *, inv_temp):
    zrow = zrow_ref[...]             # (TM, Dp) L2-normalized rows, f32
    zcol = zcol_ref[...]             # (N, Dp)  all L2-normalized rows (VMEM-resident)
    zpart = zpart_ref[...]           # (TM, Dp) partner rows: row n -> row (n + B) mod N

    zrow_s = zrow * inv_temp         # fold temperature into the small row operand

    # (TM, N) similarity block; NT contraction -> no transpose of zcol materialized.
    sim = lax.dot_general(
        zrow_s, zcol,
        dimension_numbers=(((1,), (1,)), ((), ())),
        preferred_element_type=jnp.float32,
    )

    # Positive-pair logit and the (excluded) self-similarity, both O(TM*Dp).
    pos = jnp.sum(zrow_s * zpart, axis=-1, keepdims=True)      # (TM, 1)
    diag = jnp.sum(zrow_s * zrow, axis=-1, keepdims=True)      # (TM, 1) == inv_temp for unit rows

    # logsumexp over k != n: full-row max / exp-sum, then subtract the diagonal's
    # contribution. diag is the row max for normalized rows -> no overflow.
    m = jnp.max(sim, axis=-1, keepdims=True)                   # (TM, 1)
    s = jnp.sum(jnp.exp(sim - m), axis=-1, keepdims=True)      # (TM, 1)
    s = jnp.maximum(s - jnp.exp(diag - m), 1e-30)              # guard fp cancellation -> log(0)
    lse = m + jnp.log(s)                                       # (TM, 1)

    partial = jnp.sum(lse - pos)                               # scalar partial for this row block
    out_ref[...] = jnp.full(out_ref.shape, partial, dtype=out_ref.dtype)


def _pick_row_tile(batch_size: int, n_rows: int, d_pad: int,
                   vmem_budget_bytes: int = 24 << 20):
    # Row tile must be a multiple of 8 (sublane constraint) and divide B so the
    # positive partner of a row block is itself one contiguous row block.
    # Among valid divisors pick the largest whose estimated VMEM footprint
    # (double-buffered row/partner blocks + resident columns + sim block) fits
    # under the scoped-VMEM budget; fall back to the smallest divisor otherwise.
    divisors = [tm for tm in (512, 256, 128, 64, 32, 16, 8) if batch_size % tm == 0]
    if not divisors:
        return None
    for tm in divisors:
        est = 4 * (4 * tm * d_pad           # row + partner blocks, double-buffered
                   + n_rows * d_pad         # resident column operand
                   + tm * n_rows            # (TM, N) similarity block
                   + tm * d_pad)            # scaled-row temporary
        if est <= vmem_budget_bytes:
            return tm
    return divisors[-1]


def simclr_loss(z_i: jax.Array, z_j: jax.Array, temperature: float) -> jax.Array:
    """NT-Xent loss matching SimCLR_Loss.forward. z_i, z_j: (B, D)."""
    assert z_i.shape == z_j.shape and z_i.ndim == 2
    B, D = z_i.shape
    N = 2 * B
    inv_temp = 1.0 / float(temperature)

    # Concatenate and L2-normalize once (XLA fuses this into a single pass).
    z = jnp.concatenate([z_i, z_j], axis=0).astype(jnp.float32)
    sq = jnp.sum(z * z, axis=-1, keepdims=True)
    zn = z * lax.rsqrt(jnp.maximum(sq, 1e-16))

    # Pad the feature (lane) dim to a multiple of 128; zero-padded features
    # change neither dot products nor norms.
    Dp = max(128, ((D + 127) // 128) * 128)
    if Dp != D:
        zn = jnp.pad(zn, ((0, 0), (0, Dp - D)))

    tm = _pick_row_tile(B, N, Dp)
    if tm is None:
        # Fallback for batch sizes not a multiple of 8: single row block over all
        # N rows; partner rows are provided pre-rolled by B from the wrapper.
        # TODO(synk): ragged row tiles for non-multiple-of-8 batch sizes.
        tm = N
        zpart_arr = jnp.concatenate([zn[B:], zn[:B]], axis=0)
    else:
        zpart_arr = zn

    nblocks = N // tm
    nb_half = B // tm   # 0 in the single-block fallback -> identity partner map

    kernel = functools.partial(_simclr_rowblock_kernel, inv_temp=inv_temp)

    partials = pl.pallas_call(
        kernel,
        out_shape=jax.ShapeDtypeStruct((nblocks, 8, 128), jnp.float32),
        grid=(nblocks,),
        in_specs=[
            pl.BlockSpec((tm, Dp), lambda i: (i, 0)),                        # row block
            pl.BlockSpec((N, Dp), lambda i: (0, 0)),                         # all columns (resident)
            pl.BlockSpec((tm, Dp), lambda i: ((i + nb_half) % nblocks, 0)),  # partner rows
        ],
        out_specs=pl.BlockSpec((1, 8, 128), lambda i: (i, 0, 0)),
        compiler_params=pltpu.CompilerParams(
            dimension_semantics=("parallel",),
        ),
        cost_estimate=pl.CostEstimate(
            flops=2 * N * N * Dp + 4 * N * Dp,
            transcendentals=N * (N + 2),
            bytes_accessed=(3 * N * Dp + nblocks * 8 * 128) * 4,
        ),
    )(zn, zn, zpart_arr)

    return jnp.sum(partials[:, 0, 0]) / N


def _reference_loss(z_i, z_j, temperature):
    # Pure-JAX reference mirroring the PyTorch math, for a correctness check.
    B = z_i.shape[0]
    N = 2 * B
    z = jnp.concatenate([z_i, z_j], axis=0).astype(jnp.float32)
    dots = z @ z.T
    norm = jnp.linalg.norm(z, axis=-1, keepdims=True)
    sim = dots / jnp.maximum(norm * norm.T, 1e-8) / temperature
    idx = jnp.arange(N)
    pos = sim[idx, (idx + B) % N]
    sim_masked = jnp.where(jnp.eye(N, dtype=bool), -jnp.inf, sim)
    lse = jax.scipy.special.logsumexp(sim_masked, axis=-1)
    return jnp.sum(lse - pos) / N


if __name__ == "__main__":
    batch_size = 8
    feature_dim = 32
    temperature = 0.5

    key = jax.random.PRNGKey(0)
    k1, k2 = jax.random.split(key)
    z_i = jax.random.normal(k1, (batch_size, feature_dim), dtype=jnp.float32)
    z_j = jax.random.normal(k2, (batch_size, feature_dim), dtype=jnp.float32)

    loss = simclr_loss(z_i, z_j, temperature)
    jax.block_until_ready(loss)

    ref = _reference_loss(z_i, z_j, temperature)
    assert jnp.allclose(loss, ref, rtol=1e-4, atol=1e-5), (loss, ref)

    print("KERNEL_OK")
</pallas_src>

<mosaic_0001>
module attributes {stable_mosaic.version = 11 : i64} {
  func.func @_simclr_rowblock_kernel(%arg0: i32, %arg1: memref<8x128xf32, #tpu.memory_space<vmem>>, %arg2: memref<16x128xf32, #tpu.memory_space<vmem>>, %arg3: memref<8x128xf32, #tpu.memory_space<vmem>>, %arg4: memref<1x8x128xf32, #tpu.memory_space<vmem>>) attributes {dimension_semantics = [#tpu.dimension_semantics<parallel>], iteration_bounds = array<i64: 2>, scalar_prefetch = 0 : i64, scratch_operands = 0 : i64, tpu.core_type = #tpu.core_type<tc>, window_params = [{transform_indices = @transform_0, window_bounds = array<i64: 8, 128>}, {pipeline_mode = #tpu.pipeline_mode<synchronous>, transform_indices = @transform_1, window_bounds = array<i64: 16, 128>}, {transform_indices = @transform_2, window_bounds = array<i64: 8, 128>}, {transform_indices = @transform_3, window_bounds = array<i64: 1, 8, 128>}]} {
    %c0 = arith.constant 0 : index
    %c0_0 = arith.constant 0 : index
    %0 = vector.load %arg1[%c0, %c0_0] : memref<8x128xf32, #tpu.memory_space<vmem>>, vector<8x128xf32>
    %c0_1 = arith.constant 0 : index
    %c0_2 = arith.constant 0 : index
    %1 = vector.load %arg2[%c0_1, %c0_2] : memref<16x128xf32, #tpu.memory_space<vmem>>, vector<16x128xf32>
    %c0_3 = arith.constant 0 : index
    %c0_4 = arith.constant 0 : index
    %2 = vector.load %arg3[%c0_3, %c0_4] : memref<8x128xf32, #tpu.memory_space<vmem>>, vector<8x128xf32>
    %cst = arith.constant 2.000000e+00 : f32
    %3 = vector.broadcast %cst : f32 to vector<8x128xf32>
    %4 = arith.mulf %0, %3 : vector<8x128xf32>
    %cst_5 = arith.constant dense<0.000000e+00> : vector<8x16xf32>
    %5 = tpu.matmul %4, %1, %cst_5 {dimension_numbers = #tpu.dot_dimension_numbers<[1], [1], [0], [0], [0, 0, 1, 0], [], []>} : vector<8x128xf32>, vector<16x128xf32>, vector<8x16xf32> -> vector<8x16xf32>
    %6 = arith.mulf %4, %2 : vector<8x128xf32>
    %cst_6 = arith.constant dense<0.000000e+00> : vector<8xf32>
    %7 = vector.multi_reduction <add>, %6, %cst_6 [1] : vector<8x128xf32> to vector<8xf32>
    %8 = vector.shape_cast %7 : vector<8xf32> to vector<8x1xf32>
    %9 = arith.mulf %4, %0 : vector<8x128xf32>
    %cst_7 = arith.constant dense<0.000000e+00> : vector<8xf32>
    %10 = vector.multi_reduction <add>, %9, %cst_7 [1] : vector<8x128xf32> to vector<8xf32>
    %11 = vector.shape_cast %10 : vector<8xf32> to vector<8x1xf32>
    %cst_8 = arith.constant dense<0xFF800000> : vector<8xf32>
    %12 = vector.multi_reduction <maximumf>, %5, %cst_8 [1] : vector<8x16xf32> to vector<8xf32>
    %13 = vector.shape_cast %12 : vector<8xf32> to vector<8x1xf32>
    %14 = vector.broadcast %13 : vector<8x1xf32> to vector<8x16xf32>
    %15 = arith.subf %5, %14 : vector<8x16xf32>
    %16 = math.exp %15 : vector<8x16xf32>
    %cst_9 = arith.constant dense<0.000000e+00> : vector<8xf32>
    %17 = vector.multi_reduction <add>, %16, %cst_9 [1] : vector<8x16xf32> to vector<8xf32>
    %18 = vector.shape_cast %17 : vector<8xf32> to vector<8x1xf32>
    %19 = arith.subf %11, %13 : vector<8x1xf32>
    %20 = math.exp %19 : vector<8x1xf32>
    %21 = arith.subf %18, %20 : vector<8x1xf32>
    %cst_10 = arith.constant 1.000000e-30 : f32
    %22 = vector.broadcast %cst_10 : f32 to vector<8x1xf32>
    %23 = arith.maximumf %21, %22 : vector<8x1xf32>
    %24 = math.log %23 : vector<8x1xf32>
    %25 = arith.addf %13, %24 : vector<8x1xf32>
    %26 = arith.subf %25, %8 : vector<8x1xf32>
    %27 = vector.shape_cast %26 : vector<8x1xf32> to vector<1x8x1xf32>
    %cst_11 = arith.constant dense<0.000000e+00> : vector<1xf32>
    %28 = vector.multi_reduction <add>, %27, %cst_11 [1, 2] : vector<1x8x1xf32> to vector<1xf32>
    %29 = vector.shape_cast %28 : vector<1xf32> to vector<1x1x1xf32>
    %30 = vector.extract %29[0, 0, 0] : f32 from vector<1x1x1xf32>
    %31 = vector.broadcast %30 : f32 to vector<1x8x128xf32>
    %c0_12 = arith.constant 0 : index
    %c0_13 = arith.constant 0 : index
    %c0_14 = arith.constant 0 : index
    %32 = vector.load %arg4[%c0_12, %c0_13, %c0_14] : memref<1x8x128xf32, #tpu.memory_space<vmem>>, vector<1x8x128xf32>
    tpu.vector_store %arg4[%c0_12, %c0_13, %c0_14], %31 {strides = array<i32>} : memref<1x8x128xf32, #tpu.memory_space<vmem>>, vector<1x8x128xf32>,
    return
  }
  func.func @transform_0(%arg0: i32) -> (i32, i32) {
    %c0_i32 = arith.constant 0 : i32
    %c0_i32_0 = arith.constant 0 : i32
    return %arg0, %c0_i32 : i32, i32
  }
  func.func @transform_1(%arg0: i32) -> (i32, i32) {
    %c0_i32 = arith.constant 0 : i32
    %c0_i32_0 = arith.constant 0 : i32
    %c0_i32_1 = arith.constant 0 : i32
    return %c0_i32, %c0_i32_0 : i32, i32
  }
  func.func @transform_2(%arg0: i32) -> (i32, i32) {
    %c1_i32 = arith.constant 1 : i32
    %0 = arith.addi %arg0, %c1_i32 : i32
    %c2_i32 = arith.constant 2 : i32
    %c0_i32 = arith.constant 0 : i32
    %1 = arith.cmpi eq, %c2_i32, %c0_i32 : i32
    %c1_i32_0 = arith.constant 1 : i32
    %2 = arith.select %1, %c1_i32_0, %c2_i32 : i32
    %3 = arith.remsi %0, %2 : i32
    %c0_i32_1 = arith.constant 0 : i32
    %4 = arith.cmpi ne, %3, %c0_i32_1 : i32
    %c0_i32_2 = arith.constant 0 : i32
    %5 = arith.cmpi slt, %3, %c0_i32_2 : i32
    %c0_i32_3 = arith.constant 0 : i32
    %6 = arith.cmpi slt, %2, %c0_i32_3 : i32
    %7 = arith.xori %5, %6 : i1
    %8 = arith.andi %7, %4 : i1
    %9 = arith.addi %3, %2 : i32
    %10 = arith.select %8, %9, %3 : i32
    %c0_i32_4 = arith.constant 0 : i32
    %c0_i32_5 = arith.constant 0 : i32
    return %10, %c0_i32_4 : i32, i32
  }
  func.func @transform_3(%arg0: i32) -> (i32, i32, i32) {
    %c0_i32 = arith.constant 0 : i32
    %c0_i32_0 = arith.constant 0 : i32
    %c0_i32_1 = arith.constant 0 : i32
    return %arg0, %c0_i32, %c0_i32_0 : i32, i32, i32
  }
}

</mosaic_0001>

<bundles_post_ra>
// kernel: tpu_custom_call.1
= control target key start
LH: loop header
LB: loop body
LE: loop exit
PB: predicated region body
PF: predicated region fallthrough
CT: control target
= control target key end

     0   :  { %s1173_s0 = inlined_call_operand.hbm [shape: f32[16,128], index: 0, kind: input, shape index: {}]   ;;  %s1174_s1 = inlined_call_operand.hbm [shape: f32[16,128], index: 1, kind: input, shape index: {}]   ;;  %s1175_s2 = inlined_call_operand.hbm [shape: f32[16,128], index: 2, kind: input, shape index: {}]   ;;  %s1176_s3 = inlined_call_operand.hbm [shape: f32[2,8,128], index: 3, kind: output, shape index: {}]  }
   0x1   :  { %1184 = sst [smem:[#allocation14_spill]] %s1173_s0 }
   0x2   :  { %1185 = sst [smem:[#allocation15_spill]] %s1174_s1 }
   0x3   :  { %8 = vsyncpa [#allocation3], 0 }
   0x4   :  { %10 = vsyncpa [#allocation3 + $0x1], 0 }
   0x5   :  { %11 = vsyncpa [#allocation6], 0 }
   0x6   :  { %12 = vsyncpa [#allocation4], 0 }
   0x7   :  { %14 = vsyncpa [#allocation4 + $0x1], 0  ;;  %s869_s12 = smov 0   ;;  %s871_s13 = smov 0  }
   0x8   :  { %s873_s14 = smov 0   ;;  %s875_s15 = smov 0  }
   0x9   :  { %s877_s16 = smov 0   ;;  %s879_s17 = smov 0  }
   0xa   :  { %s881_s18 = smov 0  }
   0xb LB: > { %s905_s19 = sadd.s32 4294967295, %s838_s18   ;;  %s514_s20 = sadd.s32 4294967294, %s838_s18   ;;  %s838_s18 = sphi %s881_s18, %s1222_s18   ;;  %s834_s17 = sphi %s879_s17, %s1221_s17   ;;  %s830_s16 = sphi %s877_s16, %s1220_s16   ;;  %s826_s15 = sphi %s875_s15, %s1219_s15   ;;  %s822_s14 = sphi %s873_s14, %s1218_s14   ;;  %s818_s13 = sphi %s871_s13, %s1217_s13   ;;  %s814_s12 = sphi %s869_s12, %s1216_s12  }
   0xc   : > { %s909_s21 = sadd.s32 1, %s838_s18   ;;  %s27_s22 = sadd.s32 1, %s834_s17 }
   0xd   : > { %s24_s23 = ssub.s32 %s838_s18, %s909_s21  ;;  %p34_p0 = scmp.ne.s32.totalorder %s834_s17, %s830_s16 }
   0xe   : > { %p25_p1 = scmp.eq.s32.totalorder %s24_s23, 0  ;;  %p1178_p2 = scmp.eq.s32.totalorder %s838_s18, 0 }
   0xf   : > { %p1179_p3 = scmp.ne.s32.totalorder %s830_s16, %s826_s15  ;;  %p137_p4 = scmp.eq.s32.totalorder %s905_s19, 1 }
  0x10   : > { %s921_s24 = scalar_select %p25_p1, %s834_s17, %s27_s22  }
  0x11   : > { %p925_p5 = por %p1178_p2, %p34_p0  ;;  %p929_p6 = por %p137_p4, %p34_p0 }
  0x12   : > { %1186 = sst [smem:[#allocation13_spill]] %s921_s24  ;;  %p143_p7 = scmp.eq.s32.totalorder %s514_s20, 1 }
  0x13   : > { %s1188_s26 = scalar_select %p929_p6, 1, 0 }
  0x14   : > { %p1177_p9 = scmp.lt.s32.totalorder %s838_s18, 2  ;;  %p938_p10 = por %p143_p7, %p1179_p3 }
  0x15   : > { %s176_s28 = sand.u32 1, %s838_s18   ;;  %s178_s29 = sand.u32 1, %s834_s17  }
  0x16   : > { %s1189_s27 = scalar_select %p938_p10, 1, 0 }
  0x17   : > { %s524_s30 = sshll.u32 %s178_s29, 3  ;;  %s525_s4 = sshll.u32 %s838_s18, 7 }
  0x18   : > { %s1190_s0 = sld [smem:[#allocation14_spill]]  ;;  %s180_s8 = scalar_lea.vmem [#allocation2], %s524_s30 }
  0x19   : > { %s187_s9 = sshll.u32 %s180_s8, 4  ;;  %p954_p11 = pnand %p1177_p9, %p925_p5  ;;  %s958_s9 = int_to_ptr.vmem [resolvable:$true] %s187_s9 }
  0x1a   : > { %s962_s11 = scalar_lea.sflag [#allocation3], %s176_s28 }
  0x1b   : > { %p654_p1 = pneg %p954_p11 }
  0x1e   : > { %s948_s7 = scalar_lea.hbm %s1190_s0, %s525_s4  ;;  %s657_s25 = scalar_lea.hbm %s1190_s0, 256 }
  0x1f   : > { %s652_s20 = scalar_lea.hbm %s948_s7, 128  ;;  %p658_p5 = scmp.lt.u32.totalorder %s948_s7, %s1190_s0 }
  0x20   : > { %p653_p0 = scmp.ne.s32.totalorder %s948_s7, %s652_s20  ;;  %p659_p8 = scmp.lt.u32.totalorder %s657_s25, %s652_s20 }
  0x21   : > { %p661_p2 = scmp.lt.u32.totalorder %s652_s20, %s948_s7 }
  0x22   : > { %p655_p4 = pnand %p654_p1, %p653_p0  ;;  %p660_p9 = por %p659_p8, %p658_p5 }
  0x24   : > { %p656_p7 = pneg %p655_p4  ;;  %p662_p13 = por %p661_p2, %p660_p9 }
  0x26   : > { %p663_p12 = pnand %p662_p13, %p656_p7 }
  0x28   : > { %666 = shalt.err (!%p663_p12)
}
  0x29   : > { %s667_s28 = scalar_lea.vmem %s958_s9, 128  ;;  %s840_s4 = smov [#allocation2]  }
  0x2a   : > { %p668_p0 = scmp.ne.s32.totalorder %s958_s9, %s667_s28  ;;  %s672_s5 = sshll.u32 %s840_s4, 4  ;;  %s673_s5 = int_to_ptr.vmem [resolvable:$false] %s672_s5 }
  0x2b   : > { %s674_s6 = scalar_lea.vmem %s673_s5, 256  ;;  %p675_p10 = scmp.lt.s32.totalorder %s958_s9, %s673_s5 }
  0x2c   : > { %p670_p4 = pnand %p668_p0, %p654_p1  ;;  %p676_p8 = scmp.lt.s32.totalorder %s674_s6, %s667_s28 }
  0x2e   : > { %p671_p3 = pneg %p670_p4  ;;  %p677_p5 = por %p676_p8, %p675_p10 }
  0x30   : > { %p678_p2 = pnand %p677_p5, %p671_p3 }
  0x32   : > { %681 = shalt.err (!%p678_p2)
}
  0x33   : > { %572 = dma.hbm_to_vmem [thread:$0]  (!%p954_p11), %s948_s7, 128, %s958_s9, %s962_s11  }
  0x34   : > { %p1192_p9 = scmp.ne.s32.totalorder %s830_s16, %s826_s15  ;;  %p1193_p12 = scmp.eq.s32.totalorder %s905_s19, 0 }
  0x35   : > { %p150_p3 = scmp.lt.s32.totalorder %s838_s18, 3  ;;  %p1195_p10 = scmp.ge.s32.totalorder %s838_s18, 1 }
  0x36   : > { %p995_p13 = por %p1193_p12, %p1192_p9  ;;  %s841_s20 = smov [#allocation5]  }
  0x37   : > { %p1002_p1 = pnand %p1195_p10, %p150_p3  ;;  %s162_s22 = sshll.u32 %s841_s20, 4  ;;  %s163_s22 = int_to_ptr.vmem [resolvable:$true] %s162_s22 }
  0x38   : > { %s1194_s8 = scalar_select %p995_p13, 1, 0 }
  0x39   : > { %s1196_s10 = scalar_select %p1002_p1, 1, 0 }
  0x3a   : > { %p565_p7 = pneg %p1002_p1  ;;  %p1197_p0 = pmov %p1193_p12 }
  0x3b   : > { %s1199_s1 = sld [smem:[#allocation15_spill]] }
  0x3c   : > { %p1010_p11 = pnand %p565_p7, %p1197_p0 }
  0x3e   : > { %p684_p5 = pneg %p1010_p11 }
  0x41   : > { %s682_s25 = scalar_lea.hbm %s1199_s1, 256 }
  0x42   : > { %p683_p8 = scmp.ne.s32.totalorder %s1199_s1, %s682_s25  ;;  %p689_p12 = scmp.lt.u32.totalorder %s682_s25, %s1199_s1 }
  0x44   : > { %p685_p2 = pnand %p684_p5, %p683_p8 }
  0x46   : > { %p686_p9 = pneg %p685_p2 }
  0x48   : > { %p691_p3 = pnand %p689_p12, %p686_p9 }
  0x4a   : > { %694 = shalt.err (!%p691_p3)
}
  0x4b   : > { %s695_s5 = scalar_lea.vmem %s163_s22, 256  ;;  %p703_p4 = scmp.lt.s32.totalorder %s163_s22, %s163_s22 }
  0x4c   : > { %p696_p10 = scmp.ne.s32.totalorder %s163_s22, %s695_s5  ;;  %p704_p6 = scmp.lt.s32.totalorder %s695_s5, %s695_s5 }
  0x4e   : > { %p698_p7 = pnand %p696_p10, %p684_p5  ;;  %p705_p13 = por %p704_p6, %p703_p4 }
  0x50   : > { %p699_p0 = pneg %p698_p7 }
  0x52   : > { %p706_p1 = pnand %p705_p13, %p699_p0 }
  0x54   : > { %709 = shalt.err (!%p706_p1)
}
  0x55   : > { %s842_s6 = smov 128   ;;  %s843_s20 = smov 8  }
  0x56   : > { %568 = dma.hbm_to_vmem [thread:$0]  (!%p1010_p11), %s1199_s1, 256, %s163_s22, [#allocation6], %s842_s6, %s842_s6, %s843_s20  }
  0x57   : > { %s73_s25 = ssub.s32 0, %s909_s21  ;;  %s84_s29 = sadd.s32 1, %s909_s21 }
  0x58   : > { %s515_s30 = smin.u32 %s73_s25, %s909_s21  ;;  %p85_p6 = scmp.lt.s32.totalorder %s84_s29, 0 }
  0x59   : > { %s75_s28 = sand.u32 1, %s515_s30   ;;  %s86_s4 = ssub.s32 0, %s84_s29 }
  0x5a   : > { %s76_s5 = ssub.s32 0, %s75_s28  ;;  %s518_s0 = smin.u32 %s86_s4, %s84_s29 }
  0x5b   : > { %p1200_p13 = scmp.lt.s32.totalorder %s909_s21, 0  ;;  %s88_s7 = sand.u32 1, %s518_s0  }
  0x5c   : > { %s100_s9 = sadd.s32 1, %s822_s14  ;;  %s89_s22 = ssub.s32 0, %s88_s7 }
  0x5d   : > { %s1224_s5 = smov (!%p1200_p13, %s76_s5), %s75_s28  ;;  %p107_p11 = scmp.ne.s32.totalorder %s822_s14, %s818_s13 }
  0x5e   : > { %p517_p1 = scmp.lt.s32.totalorder %s1224_s5, 0  ;;  %s82_s23 = sadd.s32 2, %s1224_s5 }
  0x5f   : > { %s1228_s22 = smov (!%p85_p6, %s89_s22), %s88_s7  ;;  %p1201_p4 = scmp.eq.s32.totalorder %s838_s18, 0 }
  0x60   : > { %s1226_s23 = smov (!%p517_p1, %s82_s23), %s1224_s5  ;;  %p113_p5 = scmp.ne.s32.totalorder %s818_s13, %s814_s12 }
  0x61   : > { %p1041_p8 = por %p107_p11, %p1201_p4  ;;  %p520_p2 = scmp.lt.s32.totalorder %s1228_s22, 0 }
  0x62   : > { %s95_s20 = sadd.s32 2, %s1228_s22  ;;  %p1203_p9 = scmp.eq.s32.totalorder %s905_s19, 0 }
  0x63   : > { %s196_s25 = sand.u32 1, %s822_s14   ;;  %s1230_s20 = smov (!%p520_p2, %s95_s20), %s1228_s22 }
  0x64   : > { %p1049_p12 = por %p113_p5, %p1203_p9  ;;  %s526_s29 = sshll.u32 %s196_s25, 3 }
  0x65   : > { %s530_s30 = sshll.u32 %s1226_s23, 7  ;;  %s97_s28 = ssub.s32 %s1226_s23, %s1230_s20 }
  0x66   : > { %s1204_s0 = scalar_select %p1049_p12, 1, 0 }
  0x67   : > { %p98_p3 = scmp.eq.s32.totalorder %s97_s28, 0  ;;  %s1057_s7 = scalar_lea.hbm %s1175_s2, %s530_s30 }
  0x68   : > { %s198_s12 = scalar_lea.vmem [#allocation7], %s526_s29  ;;  %p1205_p10 = scmp.lt.s32.totalorder %s838_s18, 2 }
  0x69   : > { %s218_s1 = sshll.u32 %s198_s12, 4  ;;  %s710_s22 = scalar_lea.hbm %s1057_s7, 128  ;;  %s219_s1 = int_to_ptr.vmem [resolvable:$true] %s218_s1 }
  0x6a   : > { %p1063_p7 = pnand %p1205_p10, %p1041_p8  ;;  %p711_p0 = scmp.ne.s32.totalorder %s1057_s7, %s710_s22 }
  0x6b   : > { %s1068_s23 = scalar_select %p98_p3, %s822_s14, %s100_s9  }
  0x6c   : > { %p712_p6 = pneg %p1063_p7  ;;  %s715_s25 = scalar_lea.hbm %s1175_s2, 256 }
  0x6d   : > { %p716_p11 = scmp.lt.u32.totalorder %s1057_s7, %s1175_s2  ;;  %p717_p4 = scmp.lt.u32.totalorder %s715_s25, %s710_s22 }
  0x6e   : > { %p713_p13 = pnand %p712_p6, %p711_p0  ;;  %p719_p5 = scmp.lt.u32.totalorder %s710_s22, %s1057_s7 }
  0x6f   : > { %p718_p8 = por %p717_p4, %p716_p11 }
  0x70   : > { %p714_p1 = pneg %p713_p13 }
  0x71   : > { %p720_p2 = por %p719_p5, %p718_p8 }
  0x73   : > { %p721_p9 = pnand %p720_p2, %p714_p1 }
  0x75   : > { %724 = shalt.err (!%p721_p9)
}
  0x76   : > { %s725_s9 = scalar_lea.vmem %s219_s1, 128  ;;  %s844_s28 = smov [#allocation7]  }
  0x77   : > { %p726_p3 = scmp.ne.s32.totalorder %s219_s1, %s725_s9  ;;  %s730_s4 = sshll.u32 %s844_s28, 4  ;;  %s731_s4 = int_to_ptr.vmem [resolvable:$false] %s730_s4 }
  0x78   : > { %s732_s5 = scalar_lea.vmem %s731_s4, 256  ;;  %p733_p13 = scmp.lt.s32.totalorder %s219_s1, %s731_s4 }
  0x79   : > { %p728_p10 = pnand %p726_p3, %p712_p6  ;;  %p734_p12 = scmp.lt.s32.totalorder %s732_s5, %s725_s9 }
  0x7b   : > { %p729_p0 = pneg %p728_p10  ;;  %p735_p4 = por %p734_p12, %p733_p13 }
  0x7d   : > { %p736_p11 = pnand %p735_p4, %p729_p0 }
  0x7f   : > { %739 = shalt.err (!%p736_p11)
}
  0x80   : > { %575 = dma.hbm_to_vmem [thread:$0]  (!%p1063_p7), %s1057_s7, 128, %s219_s1, %s962_s11  }
  0x81   : > { %p1207_p1 = scmp.ne.s32.totalorder %s1196_s10, 0 }
  0x82   : > { %s229_s12 = sand.u32 (!%p1207_p1), 1, %s905_s19   ;;  %s231_s22 = sand.u32 (!%p1207_p1), 1, %s830_s16  }
  0x83   : > { %227 = sbr.rel (%p1207_p1) target bundleno = 910 (0x38e), region = 32  ;;  %s1098_s20 = sshll.u32 (!%p1207_p1), %s231_s22, 3 }
  0x84   : > { %s230_s6 = scalar_lea.sflag (!%p1207_p1), [#allocation3], %s229_s12  ;;  %s233_s25 = scalar_lea.vmem (!%p1207_p1), [#allocation2], %s1098_s20 }
  0x85   : > { %p1208_p12 = scmp.ne.s32.totalorder (!%p1207_p1), %s1194_s8, 0 }
  0x8a   : > { %797 = dma.done.wait (%p1208_p12), %s230_s6, 128  }
  0x8b   : > { %799 = vsyncadd (%p1208_p12), %s230_s6, 4294967168  ;;  %p1209_p7 = scmp.eq.s32.totalorder %s905_s19, 0 }
  0x8d   : > { %801 = dma.done.wait (%p1209_p7), [#allocation6], 256   ;;  %p1210_p6 = pmov %p1209_p7 }
  0x8e   : > { %s244_s1 = sand.u32 1, %s818_s13   ;;  %p1211_p8 = scmp.ne.s32.totalorder %s1204_s0, 0 }
  0x8f   : > { %803 = vsyncadd (%p1210_p6), [#allocation6], 4294967040  ;;  %s534_s24 = sshll.u32 %s244_s1, 3 }
  0x90   : > { %s246_s11 = scalar_lea.vmem [#allocation7], %s534_s24 }
  0x91   : > { %805 = dma.done.wait (%p1211_p8), %s230_s6, 128  }
  0x92   : > { %807 = vsyncadd (%p1211_p8), %s230_s6, 4294967168  ;;  %v845_v0 = vmov 0.0|0.0   ;;  %vm846_vm0 = vmmov 0   ;;  %v847_v1 = vmov 0.0   ;;  %v288_v2 = vld [vmem:[#allocation5] sm:$0xff]  ;;  %v289_v3 = vld [vmem:[#allocation5 + $0x8] sm:$0xff] }
  0x93   : > { %550 = vmatprep.subr.bf16.mxu0 %v845_v0  ;;  %547 = vmatprep.mubr.msk.f32.mxu0 %vm846_vm0, %v847_v1  ;;  %v551_v4 = vpack.c.bf16 %v289_v3, %v288_v2  ;;  %v287_v5 = vld [vmem:[%s233_s25] sm:$0xff]  ;;  %vm368_vm1 = vcmask 130048   ;;  %vm387_vm2 = vcmask 7168   ;;  %s273_s8 = scalar_lea.vmem [#allocation8], %s1098_s20  ;;  %s537_s0 = sshll.u32 %s905_s19, 7 }
  0x94   : > { %v291_v6 = vmul.f32 2.0, %v287_v5  ;;  %v290_v14 = vld [vmem:[%s246_s11] sm:$0xff]  ;;  %s414_s10 = sshll.u32 %s273_s8, 4  ;;  %s1121_s9 = scalar_lea.hbm %s1176_s3, %s537_s0  ;;  %s1116_s10 = int_to_ptr.vmem [resolvable:$true] %s414_s10 }
  0x95   : > { %552 = vmatpush3.bf16.xpose.msra.mxu0 %v551_v4  ;;  %s401_s28 = scalar_lea.sflag [#allocation4], %s231_s22  ;;  %s740_s4 = scalar_lea.vmem %s1116_s10, 128 }
  0x96   : > { %v365_v10 = vmul.f32 %v291_v6, %v287_v5  ;;  %v362_v17 = vmul.f32 %v291_v6, %v290_v14  ;;  %p741_p5 = scmp.ne.s32.totalorder %s1116_s10, %s740_s4  ;;  %p1212_p2 = scmp.ne.s32.totalorder %s1188_s26, 0 }
  0x97   : > { %s848_s19 = smov [#allocation8]  }
  0x98   : > { %p742_p9 = pnand %p741_p5, %p1212_p2  ;;  %s744_s5 = sshll.u32 %s848_s19, 4  ;;  %s745_s5 = int_to_ptr.vmem [resolvable:$false] %s744_s5 }
  0x99   : > { %s746_s12 = scalar_lea.vmem %s745_s5, 256  ;;  %p747_p10 = scmp.lt.s32.totalorder %s1116_s10, %s745_s5 }
  0x9a   : > { %p743_p3 = pneg %p742_p9  ;;  %p748_p0 = scmp.lt.s32.totalorder %s746_s12, %s740_s4 }
  0x9c   : > { %548 = vmatmul.mubr.f32.vlgmr.msra.gmra.mrb[0].mxu0 %v291_v6  ;;  %p749_p13 = por %p748_p0, %p747_p10 }
  0x9e   : > { %p750_p4 = pnand %p749_p13, %p743_p3 }
 0x16f   : > { %v358_v7 = vpop.f32.mrb[0].mxu0 }
 0x170   : > { %v549_v8 = vpop.f32.mrb[1].mxu0  ;;  %v369_v9 = vsel %vm368_vm1, %v358_v7, -inf }
 0x171   : > { %370 = vmax.xlane.f32.xlu0 %v369_v9 }
 0x175   : > { %366 = vadd.xlane.f32.xlu0 %v365_v10 }
 0x1fe   : > { %v371_v11 = vpop.xlane.xlu0 %370 }
 0x1ff   : > { %v372_v12 = vsub.f32 %v358_v7, %v371_v11 }
 0x201   : > { %v373_v13 = vmul.f32 1.442695, %v372_v12 }
 0x202   : > { %v367_v18 = vpop.xlane.xlu0 %366 }
 0x203   : > { %646 = vpow2.f32 %v373_v13  ;;  %v378_v19 = vsub.f32 %v367_v18, %v371_v11 }
 0x205   : > { %v379_v20 = vmul.f32 1.442695, %v378_v19 }
 0x207   : > { %648 = vpow2.f32 %v379_v20 }
 0x20d   : > { %v647_v15 = vpop.eup %646 }
 0x20e   : > { %v375_v16 = vsel %vm368_vm1, %v647_v15, 0.0 }
 0x20f   : > { %376 = vadd.xlane.f32.xlu1 %v375_v16 }
 0x211   : > { %v649_v21 = vpop.eup %648 }
 0x213   : > { %363 = vadd.xlane.f32.xlu1 %v362_v17 }
 0x29c   : > { %v377_v22 = vpop.xlane.xlu1 %376 }
 0x29d   : > { %v381_v23 = vsub.f32 %v377_v22, %v649_v21 }
 0x29f   : > { %v382_v24 = vmax.f32 %v381_v23, 1e-30 }
 0x2a0   : > { %v364_v27 = vpop.xlane.xlu1 %363 }
 0x2a1   : > { %650 = vlog2.f32 %v382_v24 }
 0x2ab   : > { %v651_v25 = vpop.eup %650 }
 0x2ac   : > { %v384_v26 = vmul.f32 0.6931472, %v651_v25 }
 0x2ae   : > { %v385_v28 = vadd.f32 %v384_v26, %v371_v11 }
 0x2b0   : > { %v386_v29 = vsub.f32 %v385_v28, %v364_v27 }
 0x2b2   : > { %v388_v30 = vsel %vm387_vm2, %v386_v29, 0.0 }
 0x2b3   : > { %389 = vadd.xlane.f32.xlu0 %v388_v30 }
 0x340   : > { %v390_v31 = vpop.xlane.xlu0 %389 }
 0x341   : > { %v391_v32 = vrot.slane %v390_v31, 4 }
 0x343   : > { %v392_v33 = vadd.f32 %v391_v32, %v390_v31 }
 0x345   : > { %v393_v34 = vrot.slane %v392_v33, 2 }
 0x347   : > { %v394_v35 = vadd.f32 %v393_v34, %v392_v33 }
 0x349   : > { %v395_v36 = vrot.slane %v394_v35, 1 }
 0x34b   : > { %v396_v37 = vadd.f32 %v395_v36, %v394_v35 }
 0x34d   : > { %553 = vpush %v396_v37 }
 0x37e   : > { %s554_s7 = spop %553 }
 0x37f   : > { %v398_v38 = vstv %s554_s7 }
 0x380   : > { %399 = vst [vmem:[%s273_s8] sm:$0xff] %v398_v38 }
 0x381   : > { %753 = shalt.err (!%p750_p4)
}
 0x382   : > { %s754_s22 = scalar_lea.hbm %s1121_s9, 128  ;;  %s758_s25 = scalar_lea.hbm %s1176_s3, 256 }
 0x383   : > { %p755_p11 = scmp.ne.s32.totalorder %s1121_s9, %s754_s22  ;;  %p759_p7 = scmp.lt.u32.totalorder %s1121_s9, %s1176_s3 }
 0x384   : > { %p760_p6 = scmp.lt.u32.totalorder %s758_s25, %s754_s22  ;;  %p762_p5 = scmp.lt.u32.totalorder %s754_s22, %s1121_s9 }
 0x385   : > { %p756_p1 = pnand %p755_p11, %p1212_p2 }
 0x386   : > { %p761_p8 = por %p760_p6, %p759_p7 }
 0x387   : > { %p757_p12 = pneg %p756_p1 }
 0x388   : > { %p763_p9 = por %p762_p5, %p761_p8 }
 0x38a   : > { %p764_p3 = pnand %p763_p9, %p757_p12 }
 0x38c   : > { %767 = shalt.err (!%p764_p3)
}
 0x38d   : > { %563 = dma.vmem_to_hbm [thread:$0]  (%p1212_p2), %s1116_s10, 128, %s1121_s9, %s401_s28  }
 0x38e PF: > { %s426_s11 = sand.u32 1, %s826_s15   ;;  %p1213_p10 = scmp.ne.s32.totalorder %s1189_s27, 0 }
 0x38f   : > { %p1214_p0 = scmp.ge.s32.totalorder %s838_s18, 2  ;;  %s427_s8 = scalar_lea.sflag [#allocation4], %s426_s11 }
 0x391   : > { %p577_p13 = pnand %p1214_p0, %p1213_p10 }
 0x393   : > { %809 = dma.done.wait (!%p577_p13), %s427_s8, 128  }
 0x394   : > { %811 = vsyncadd (!%p577_p13), %s427_s8, 4294967168  ;;  %s1215_s26 = sld [smem:[#allocation13_spill]]  ;;  %p17_p2 = scmp.ge.s32.totalorder %s909_s21, 4  }
 0x395   : > { %s1216_s12 = smov %s818_s13  ;;  %s1217_s13 = smov %s822_s14 }
 0x396   : > { %s1218_s14 = smov %s1068_s23  ;;  %s1219_s15 = smov %s830_s16 }
 0x397   : > { %s1220_s16 = smov %s834_s17  ;;  %s1222_s18 = smov %s909_s21 }
 0x398   :  { %19 = sbr.rel (!%p17_p2) target bundleno = 11 (0xb), region = 92 }
 0x39a   : > { %s1221_s17 = smov %s1215_s26 }
 0x39f   :  { %432 = vsyncpa [#allocation3], 1 }
 0x3a0   :  { %434 = vsyncpa [#allocation3 + $0x1], 1 }
 0x3a1   :  { %435 = vsyncpa [#allocation6], 1 }
 0x3a2   :  { %436 = vsyncpa [#allocation4], 1 }
 0x3a3   :  { %438 = vsyncpa [#allocation4 + $0x1], 1 }

</bundles_post_ra>
